<compile_context>
chip_gen: v5e
topology: v5e:2x2
jax: 0.10.0
libtpu: 0.0.40
codegen_flags: <defaults>
</compile_context>

<pallas_src>
import jax
import jax.numpy as jnp
from jax import lax
from jax.experimental import pallas as pl
from jax.experimental.pallas import tpu as pltpu

IMAGE_SIZE = 28 * 28
NFC0 = 100
NFC1 = 50
NFC2 = 10          # nclasses
BN_EPS = 1e-5

# Lane-dense padded feature widths (128-lane vregs / MXU tiles).
NFC0_PAD = 128
NFC1_PAD = 128
NFC2_PAD = 128

# Packed small-parameter layout: each segment is a full 128-lane slot.
_OFF_G0, _OFF_BE0, _OFF_G1, _OFF_BE1, _OFF_B2 = 0, 128, 256, 384, 512
_PACKED_LEN = 640


def _bn_relu_train(h, gamma, beta, inv_b):
    """Training-mode BatchNorm1d (biased batch variance, eps=1e-5) + ReLU.

    Single-pass statistics (sum and sum-of-squares), var = E[h^2] - mean^2,
    clamped at 0 to guard against f32 cancellation.  All in f32.
    Padded feature columns (h == 0, gamma == 0, beta == 0) stay exactly 0.
    """
    s = jnp.sum(h, axis=0, keepdims=True)
    ss = jnp.sum(h * h, axis=0, keepdims=True)
    mean = s * inv_b
    var = jnp.maximum(ss * inv_b - mean * mean, 0.0)
    y = (h - mean) * lax.rsqrt(var + BN_EPS) * gamma + beta
    return jnp.maximum(y, 0.0)


def thirdnet_kernel(x_ref, w0_ref, w12_ref, pvec_ref, out_ref):
    # In-kernel f32 -> bf16 cast of the input (review item 1).
    x = x_ref[...].astype(jnp.bfloat16)              # [B, 784]
    inv_b = jnp.float32(1.0 / x_ref.shape[0])        # static at trace time

    # Unpack the consolidated small-parameter vector (f32, 128-lane slots).
    g0 = pvec_ref[:, _OFF_G0:_OFF_G0 + NFC0_PAD]     # [1, 128]
    be0 = pvec_ref[:, _OFF_BE0:_OFF_BE0 + NFC0_PAD]  # [1, 128]
    g1 = pvec_ref[:, _OFF_G1:_OFF_G1 + NFC1_PAD]     # [1, 128]
    be1 = pvec_ref[:, _OFF_BE1:_OFF_BE1 + NFC1_PAD]  # [1, 128]
    b2 = pvec_ref[:, _OFF_B2:_OFF_B2 + NFC2_PAD]     # [1, 128]

    # Unpack the concatenated fc1/fc2 weights (bf16, lane-aligned slices).
    w12 = w12_ref[...]                               # [128, 256]
    w1 = w12[:, :NFC1_PAD]                           # [128, 128]
    w2 = w12[:, NFC1_PAD:NFC1_PAD + NFC2_PAD]        # [128, 128]

    # fc0 (bias folded away by training-mode BN) -> bn0 -> relu
    h0 = jnp.dot(x, w0_ref[...], preferred_element_type=jnp.float32)  # [B,128]
    h0 = _bn_relu_train(h0, g0, be0, inv_b)

    # fc1 (bias folded away) -> bn1 -> relu
    h1 = jnp.dot(h0.astype(jnp.bfloat16), w1,
                 preferred_element_type=jnp.float32)                  # [B,128]
    h1 = _bn_relu_train(h1, g1, be1, inv_b)

    # fc2 -> log_softmax(dim=-1) on the real NFC2 classes (f32 epilogue).
    logits_full = jnp.dot(h1.astype(jnp.bfloat16), w2,
                          preferred_element_type=jnp.float32) + b2    # [B,128]
    logits = logits_full[:, :NFC2]                                     # [B,10]
    m = jnp.max(logits, axis=-1, keepdims=True)
    shifted = logits - m
    lse = jnp.log(jnp.sum(jnp.exp(shifted), axis=-1, keepdims=True))
    out_ref[...] = shifted - lse


def thirdnet_forward(x, kernel_params):
    """x: [B, IMAGE_SIZE] f32 (or any float; cast happens in-kernel).

    kernel_params: dict with "w0" [784,128] bf16, "w12" [128,256] bf16,
    "pvec" [1,640] f32.  Intended to be called under jax.jit.
    """
    B = x.shape[0]
    args = (x, kernel_params["w0"], kernel_params["w12"], kernel_params["pvec"])

    vmem_spec = pl.BlockSpec(memory_space=pltpu.MemorySpace.VMEM)

    matmul_flops = 2 * B * (IMAGE_SIZE * NFC0_PAD
                            + NFC0_PAD * NFC1_PAD
                            + NFC1_PAD * NFC2_PAD)
    bytes_accessed = (
        2 * (IMAGE_SIZE * NFC0_PAD + NFC0_PAD * (NFC1_PAD + NFC2_PAD))  # bf16 w
        + 4 * B * IMAGE_SIZE                                            # f32 x
        + 4 * _PACKED_LEN                                               # pvec
        + 4 * B * NFC2)                                                 # out
    transcendentals = B * (NFC2 + 1) + NFC0_PAD + NFC1_PAD              # exp/log/rsqrt

    return pl.pallas_call(
        thirdnet_kernel,
        out_shape=jax.ShapeDtypeStruct((B, NFC2), jnp.float32),
        in_specs=[vmem_spec] * len(args),
        out_specs=vmem_spec,
        cost_estimate=pl.CostEstimate(
            flops=matmul_flops,
            transcendentals=transcendentals,
            bytes_accessed=bytes_accessed),
    )(*args)


def init_params(key):
    """Synthetic init mimicking PyTorch defaults, pre-padded + packed for TPU.

    Linear weights: uniform(-1/sqrt(fan_in), 1/sqrt(fan_in)), stored [in, out],
    zero-padded to lane-dense widths and cast to bf16.  BatchNorm1d: gamma=1,
    beta=0 on real features, exactly 0 on padded features.  fc0/fc1 biases are
    intentionally omitted (training-mode BN cancels them); fc2's bias is kept.
    Returns (kernel_params, ref_params).
    """
    keys = jax.random.split(key, 4)

    def linear_w(k, fan_in, fan_out):
        bound = 1.0 / jnp.sqrt(jnp.float32(fan_in))
        return jax.random.uniform(k, (fan_in, fan_out), jnp.float32, -bound, bound)

    w0 = linear_w(keys[0], IMAGE_SIZE, NFC0)          # [784, 100]
    w1 = linear_w(keys[1], NFC0, NFC1)                # [100, 50]
    w2 = linear_w(keys[2], NFC1, NFC2)                # [50, 10]
    bound2 = 1.0 / jnp.sqrt(jnp.float32(NFC1))
    b2 = jax.random.uniform(keys[3], (NFC2,), jnp.float32, -bound2, bound2)

    g0, be0 = jnp.ones((NFC0,), jnp.float32), jnp.zeros((NFC0,), jnp.float32)
    g1, be1 = jnp.ones((NFC1,), jnp.float32), jnp.zeros((NFC1,), jnp.float32)

    # Zero-pad weights to lane-dense shapes (padded gamma/beta stay 0, so the
    # padded columns are exactly 0 all the way through the network).
    w0_pad = jnp.zeros((IMAGE_SIZE, NFC0_PAD), jnp.float32).at[:, :NFC0].set(w0)
    w1_pad = jnp.zeros((NFC0_PAD, NFC1_PAD), jnp.float32).at[:NFC0, :NFC1].set(w1)
    w2_pad = jnp.zeros((NFC1_PAD, NFC2_PAD), jnp.float32).at[:NFC1, :NFC2].set(w2)
    w12_pad = jnp.concatenate([w1_pad, w2_pad], axis=1)     # [128, 256]

    pvec = jnp.zeros((1, _PACKED_LEN), jnp.float32)
    pvec = pvec.at[0, _OFF_G0:_OFF_G0 + NFC0].set(g0)
    pvec = pvec.at[0, _OFF_BE0:_OFF_BE0 + NFC0].set(be0)
    pvec = pvec.at[0, _OFF_G1:_OFF_G1 + NFC1].set(g1)
    pvec = pvec.at[0, _OFF_BE1:_OFF_BE1 + NFC1].set(be1)
    pvec = pvec.at[0, _OFF_B2:_OFF_B2 + NFC2].set(b2)

    kernel_params = {
        "w0": w0_pad.astype(jnp.bfloat16),
        "w12": w12_pad.astype(jnp.bfloat16),
        "pvec": pvec,
    }
    ref_params = {
        "w0": w0, "w1": w1, "w2": w2, "b2": b2,
        "g0": g0, "be0": be0, "g1": g1, "be1": be1,
    }
    return kernel_params, ref_params


def _reference_forward(x, p):
    """Pure-JAX reference with the same bf16-matmul / f32-accumulate recipe."""
    def bn(h, g, b):
        mean = jnp.mean(h, axis=0, keepdims=True)
        var = jnp.mean((h - mean) ** 2, axis=0, keepdims=True)
        return (h - mean) * lax.rsqrt(var + BN_EPS) * g + b

    xb = x.astype(jnp.bfloat16)
    h0 = jnp.dot(xb, p["w0"].astype(jnp.bfloat16),
                 preferred_element_type=jnp.float32)
    h0 = jnp.maximum(bn(h0, p["g0"], p["be0"]), 0.0)
    h1 = jnp.dot(h0.astype(jnp.bfloat16), p["w1"].astype(jnp.bfloat16),
                 preferred_element_type=jnp.float32)
    h1 = jnp.maximum(bn(h1, p["g1"], p["be1"]), 0.0)
    logits = jnp.dot(h1.astype(jnp.bfloat16), p["w2"].astype(jnp.bfloat16),
                     preferred_element_type=jnp.float32) + p["b2"]
    return jax.nn.log_softmax(logits, axis=-1)


if __name__ == "__main__":
    key = jax.random.PRNGKey(0)
    k_params, k_x = jax.random.split(key)
    kernel_params, ref_params = init_params(k_params)

    B = 8  # small batch (>1 so batch-norm statistics are meaningful)
    x = jax.random.normal(k_x, (B, IMAGE_SIZE), jnp.float32)

    forward = jax.jit(thirdnet_forward)
    out = jax.block_until_ready(forward(x, kernel_params))

    assert out.shape == (B, NFC2)
    assert bool(jnp.all(jnp.isfinite(out)))

    # log_softmax rows must (log-)sum to ~0 (exact up to f32 rounding)
    row_logsum = jnp.log(jnp.sum(jnp.exp(out), axis=-1))
    assert bool(jnp.all(jnp.abs(row_logsum) < 1e-4))

    # cross-check against a pure-JAX reference using the same precision recipe
    ref = jax.block_until_ready(_reference_forward(x, ref_params))
    max_err = float(jnp.max(jnp.abs(out - ref)))
    assert max_err < 2e-2, max_err

    print("KERNEL_OK")
</pallas_src>

<mosaic_0001>
module attributes {stable_mosaic.version = 11 : i64} {
  func.func @thirdnet_kernel(%arg0: memref<8x784xf32, #tpu.memory_space<vmem>>, %arg1: memref<784x128xbf16, #tpu.memory_space<vmem>>, %arg2: memref<128x256xbf16, #tpu.memory_space<vmem>>, %arg3: memref<1x640xf32, #tpu.memory_space<vmem>>, %arg4: memref<8x10xf32, #tpu.memory_space<vmem>>) attributes {dimension_semantics = [], scalar_prefetch = 0 : i64, scratch_operands = 0 : i64, tpu.core_type = #tpu.core_type<tc>} {
    %c0 = arith.constant 0 : index
    %c0_0 = arith.constant 0 : index
    %0 = vector.load %arg0[%c0, %c0_0] : memref<8x784xf32, #tpu.memory_space<vmem>>, vector<8x784xf32>
    %1 = arith.truncf %0 : vector<8x784xf32> to vector<8x784xbf16>
    %c0_1 = arith.constant 0 : index
    %c0_2 = arith.constant 0 : index
    %2 = vector.load %arg3[%c0_1, %c0_2] : memref<1x640xf32, #tpu.memory_space<vmem>>, vector<1x128xf32>
    %c0_3 = arith.constant 0 : index
    %c128 = arith.constant 128 : index
    %3 = vector.load %arg3[%c0_3, %c128] : memref<1x640xf32, #tpu.memory_space<vmem>>, vector<1x128xf32>
    %c0_4 = arith.constant 0 : index
    %c256 = arith.constant 256 : index
    %4 = vector.load %arg3[%c0_4, %c256] : memref<1x640xf32, #tpu.memory_space<vmem>>, vector<1x128xf32>
    %c0_5 = arith.constant 0 : index
    %c384 = arith.constant 384 : index
    %5 = vector.load %arg3[%c0_5, %c384] : memref<1x640xf32, #tpu.memory_space<vmem>>, vector<1x128xf32>
    %c0_6 = arith.constant 0 : index
    %c512 = arith.constant 512 : index
    %6 = vector.load %arg3[%c0_6, %c512] : memref<1x640xf32, #tpu.memory_space<vmem>>, vector<1x128xf32>
    %c0_7 = arith.constant 0 : index
    %c0_8 = arith.constant 0 : index
    %7 = vector.load %arg2[%c0_7, %c0_8] : memref<128x256xbf16, #tpu.memory_space<vmem>>, vector<128x256xbf16>
    %8 = vector.extract_strided_slice %7 {offsets = [0, 0], sizes = [128, 128], strides = [1, 1]} : vector<128x256xbf16> to vector<128x128xbf16>
    %9 = vector.extract_strided_slice %7 {offsets = [0, 128], sizes = [128, 128], strides = [1, 1]} : vector<128x256xbf16> to vector<128x128xbf16>
    %c0_9 = arith.constant 0 : index
    %c0_10 = arith.constant 0 : index
    %10 = vector.load %arg1[%c0_9, %c0_10] : memref<784x128xbf16, #tpu.memory_space<vmem>>, vector<784x128xbf16>
    %cst = arith.constant dense<0.000000e+00> : vector<8x128xf32>
    %11 = tpu.matmul %1, %10, %cst {dimension_numbers = #tpu.dot_dimension_numbers<[1], [0], [0], [1], [0, 0, 1, 1], [], []>} : vector<8x784xbf16>, vector<784x128xbf16>, vector<8x128xf32> -> vector<8x128xf32>
    %cst_11 = arith.constant dense<0.000000e+00> : vector<128xf32>
    %12 = vector.multi_reduction <add>, %11, %cst_11 [0] : vector<8x128xf32> to vector<128xf32>
    %13 = vector.shape_cast %12 : vector<128xf32> to vector<1x128xf32>
    %14 = arith.mulf %11, %11 : vector<8x128xf32>
    %cst_12 = arith.constant dense<0.000000e+00> : vector<128xf32>
    %15 = vector.multi_reduction <add>, %14, %cst_12 [0] : vector<8x128xf32> to vector<128xf32>
    %16 = vector.shape_cast %15 : vector<128xf32> to vector<1x128xf32>
    %cst_13 = arith.constant 1.250000e-01 : f32
    %17 = vector.broadcast %cst_13 : f32 to vector<1x128xf32>
    %18 = arith.mulf %13, %17 : vector<1x128xf32>
    %cst_14 = arith.constant 1.250000e-01 : f32
    %19 = vector.broadcast %cst_14 : f32 to vector<1x128xf32>
    %20 = arith.mulf %16, %19 : vector<1x128xf32>
    %21 = arith.mulf %18, %18 : vector<1x128xf32>
    %22 = arith.subf %20, %21 : vector<1x128xf32>
    %cst_15 = arith.constant 0.000000e+00 : f32
    %23 = vector.broadcast %cst_15 : f32 to vector<1x128xf32>
    %24 = arith.maximumf %22, %23 : vector<1x128xf32>
    %25 = vector.broadcast %18 : vector<1x128xf32> to vector<8x128xf32>
    %26 = arith.subf %11, %25 : vector<8x128xf32>
    %cst_16 = arith.constant 9.99999974E-6 : f32
    %27 = vector.broadcast %cst_16 : f32 to vector<1x128xf32>
    %28 = arith.addf %24, %27 : vector<1x128xf32>
    %29 = math.rsqrt %28 : vector<1x128xf32>
    %30 = vector.broadcast %29 : vector<1x128xf32> to vector<8x128xf32>
    %31 = arith.mulf %26, %30 : vector<8x128xf32>
    %32 = vector.broadcast %2 : vector<1x128xf32> to vector<8x128xf32>
    %33 = arith.mulf %31, %32 : vector<8x128xf32>
    %34 = vector.broadcast %3 : vector<1x128xf32> to vector<8x128xf32>
    %35 = arith.addf %33, %34 : vector<8x128xf32>
    %cst_17 = arith.constant 0.000000e+00 : f32
    %36 = vector.broadcast %cst_17 : f32 to vector<8x128xf32>
    %37 = arith.maximumf %35, %36 : vector<8x128xf32>
    %38 = arith.truncf %37 : vector<8x128xf32> to vector<8x128xbf16>
    %cst_18 = arith.constant dense<0.000000e+00> : vector<8x128xf32>
    %39 = tpu.matmul %38, %8, %cst_18 {dimension_numbers = #tpu.dot_dimension_numbers<[1], [0], [0], [1], [0, 0, 1, 1], [], []>} : vector<8x128xbf16>, vector<128x128xbf16>, vector<8x128xf32> -> vector<8x128xf32>
    %cst_19 = arith.constant dense<0.000000e+00> : vector<128xf32>
    %40 = vector.multi_reduction <add>, %39, %cst_19 [0] : vector<8x128xf32> to vector<128xf32>
    %41 = vector.shape_cast %40 : vector<128xf32> to vector<1x128xf32>
    %42 = arith.mulf %39, %39 : vector<8x128xf32>
    %cst_20 = arith.constant dense<0.000000e+00> : vector<128xf32>
    %43 = vector.multi_reduction <add>, %42, %cst_20 [0] : vector<8x128xf32> to vector<128xf32>
    %44 = vector.shape_cast %43 : vector<128xf32> to vector<1x128xf32>
    %cst_21 = arith.constant 1.250000e-01 : f32
    %45 = vector.broadcast %cst_21 : f32 to vector<1x128xf32>
    %46 = arith.mulf %41, %45 : vector<1x128xf32>
    %cst_22 = arith.constant 1.250000e-01 : f32
    %47 = vector.broadcast %cst_22 : f32 to vector<1x128xf32>
    %48 = arith.mulf %44, %47 : vector<1x128xf32>
    %49 = arith.mulf %46, %46 : vector<1x128xf32>
    %50 = arith.subf %48, %49 : vector<1x128xf32>
    %cst_23 = arith.constant 0.000000e+00 : f32
    %51 = vector.broadcast %cst_23 : f32 to vector<1x128xf32>
    %52 = arith.maximumf %50, %51 : vector<1x128xf32>
    %53 = vector.broadcast %46 : vector<1x128xf32> to vector<8x128xf32>
    %54 = arith.subf %39, %53 : vector<8x128xf32>
    %cst_24 = arith.constant 9.99999974E-6 : f32
    %55 = vector.broadcast %cst_24 : f32 to vector<1x128xf32>
    %56 = arith.addf %52, %55 : vector<1x128xf32>
    %57 = math.rsqrt %56 : vector<1x128xf32>
    %58 = vector.broadcast %57 : vector<1x128xf32> to vector<8x128xf32>
    %59 = arith.mulf %54, %58 : vector<8x128xf32>
    %60 = vector.broadcast %4 : vector<1x128xf32> to vector<8x128xf32>
    %61 = arith.mulf %59, %60 : vector<8x128xf32>
    %62 = vector.broadcast %5 : vector<1x128xf32> to vector<8x128xf32>
    %63 = arith.addf %61, %62 : vector<8x128xf32>
    %cst_25 = arith.constant 0.000000e+00 : f32
    %64 = vector.broadcast %cst_25 : f32 to vector<8x128xf32>
    %65 = arith.maximumf %63, %64 : vector<8x128xf32>
    %66 = arith.truncf %65 : vector<8x128xf32> to vector<8x128xbf16>
    %cst_26 = arith.constant dense<0.000000e+00> : vector<8x128xf32>
    %67 = tpu.matmul %66, %9, %cst_26 {dimension_numbers = #tpu.dot_dimension_numbers<[1], [0], [0], [1], [0, 0, 1, 1], [], []>} : vector<8x128xbf16>, vector<128x128xbf16>, vector<8x128xf32> -> vector<8x128xf32>
    %68 = vector.broadcast %6 : vector<1x128xf32> to vector<8x128xf32>
    %69 = arith.addf %67, %68 : vector<8x128xf32>
    %70 = vector.extract_strided_slice %69 {offsets = [0, 0], sizes = [8, 10], strides = [1, 1]} : vector<8x128xf32> to vector<8x10xf32>
    %cst_27 = arith.constant dense<0xFF800000> : vector<8xf32>
    %71 = vector.multi_reduction <maximumf>, %70, %cst_27 [1] : vector<8x10xf32> to vector<8xf32>
    %72 = vector.shape_cast %71 : vector<8xf32> to vector<8x1xf32>
    %73 = vector.broadcast %72 : vector<8x1xf32> to vector<8x10xf32>
    %74 = arith.subf %70, %73 : vector<8x10xf32>
    %75 = math.exp %74 : vector<8x10xf32>
    %cst_28 = arith.constant dense<0.000000e+00> : vector<8xf32>
    %76 = vector.multi_reduction <add>, %75, %cst_28 [1] : vector<8x10xf32> to vector<8xf32>
    %77 = vector.shape_cast %76 : vector<8xf32> to vector<8x1xf32>
    %78 = math.log %77 : vector<8x1xf32>
    %79 = vector.broadcast %78 : vector<8x1xf32> to vector<8x10xf32>
    %80 = arith.subf %74, %79 : vector<8x10xf32>
    %c0_29 = arith.constant 0 : index
    %c0_30 = arith.constant 0 : index
    %81 = vector.load %arg4[%c0_29, %c0_30] : memref<8x10xf32, #tpu.memory_space<vmem>>, vector<8x10xf32>
    tpu.vector_store %arg4[%c0_29, %c0_30], %80 {strides = array<i32>} : memref<8x10xf32, #tpu.memory_space<vmem>>, vector<8x10xf32>,
    return
  }
}

</mosaic_0001>

<bundles_post_ra>
// kernel: thirdnet_forward.1
= control target key start
LH: loop header
LB: loop body
LE: loop exit
PB: predicated region body
PF: predicated region fallthrough
CT: control target
= control target key end

     0   :  { %9 = vsyncpa [#allocation3], 0  ;;  %s1352_s0 = inlined_call_operand.hbm [shape: f32[8,784], index: 0, kind: input, shape index: {}]   ;;  %s1353_s1 = inlined_call_operand.hbm [shape: bf16[784,128], index: 1, kind: input, shape index: {}]   ;;  %s1354_s2 = inlined_call_operand.hbm [shape: bf16[128,256], index: 2, kind: input, shape index: {}]   ;;  %s1355_s3 = inlined_call_operand.hbm [shape: f32[1,640], index: 3, kind: input, shape index: {}]   ;;  %s1356_s4 = inlined_call_operand.hbm [shape: f32[8,10], index: 4, kind: output, shape index: {}]  }
   0x1   :  { %10 = vsyncpa [#allocation6], 0 }
   0x2   :  { %11 = vsyncpa [#allocation9], 0  ;;  %s28_s17 = sshll.u32 %s1353_s1, 4  ;;  %s29_s17 = int_to_ptr.hbm [resolvable:$true] %s28_s17 }
   0x3   :  { %12 = vsyncpa [#allocation4], 0  ;;  %s1300_s18 = smov [#allocation5]   ;;  %s18_s22 = sshll.u32 %s1352_s0, 4  ;;  %s19_s22 = int_to_ptr.hbm [resolvable:$true] %s18_s22 }
   0x4   :  { %s30_s19 = sshll.u32 %s1300_s18, 4  ;;  %s1301_s23 = smov 64   ;;  %s31_s19 = int_to_ptr.vmem [resolvable:$true] %s30_s19 }
   0x5   :  { %s1302_s24 = smov 4   ;;  %s1303_s25 = smov [#allocation2]  }
   0x6   :  { %36 = dma.hbm_to_vmem [thread:$0]  %s29_s17, 6272, %s31_s19, [#allocation6], %s1301_s23, %s1301_s23, %s1302_s24  }
   0x7   :  { %s20_s26 = sshll.u32 %s1303_s25, 4  ;;  %s41_s29 = sshll.u32 %s1354_s2, 4  ;;  %s21_s26 = int_to_ptr.vmem [resolvable:$true] %s20_s26  ;;  %s42_s29 = int_to_ptr.hbm [resolvable:$true] %s41_s29 }
   0x8   :  { %23 = dma.hbm_to_vmem [thread:$0]  %s19_s22, 896, %s21_s26, [#allocation3]  }
   0x9   :  { %s1304_s1 = smov [#allocation7]   ;;  %s55_s0 = sshll.u32 %s1355_s3, 4  ;;  %s56_s0 = int_to_ptr.hbm [resolvable:$true] %s55_s0 }
   0xa   :  { %s43_s30 = sshll.u32 %s1304_s1, 4  ;;  %s1305_s7 = smov 128   ;;  %s44_s30 = int_to_ptr.vmem [resolvable:$true] %s43_s30 }
   0xb   :  { %s1306_s8 = smov 8   ;;  %s1307_s9 = smov [#allocation8]  }
   0xc   :  { %49 = dma.hbm_to_vmem [thread:$0]  %s42_s29, 2048, %s44_s30, [#allocation6], %s1305_s7, %s1305_s7, %s1306_s8  }
   0xd   :  { %s57_s10 = sshll.u32 %s1307_s9, 4  ;;  %s58_s10 = int_to_ptr.vmem [resolvable:$true] %s57_s10 }
   0xe   :  { %60 = dma.hbm_to_vmem [thread:$0]  %s56_s0, 80, %s58_s10, [#allocation9]  }
   0xf   :  { %1292 = dma.done.wait [#allocation3], 896  }
  0x10   :  { %1293 = vsyncadd [#allocation3], 4294966400 }
  0x11   :  { %1294 = dma.done.wait [#allocation6], 8320  }
  0x12   :  { %1295 = vsyncadd [#allocation6], 4294958976 }
  0x13   :  { %1296 = dma.done.wait [#allocation9], 80  }
  0x14   :  { %1297 = vsyncadd [#allocation9], 4294967216  ;;  %v1108_v0 = vld [vmem:[#allocation5 + $0x38] sm:$0xff]  ;;  %v1107_v3 = vld [vmem:[#allocation5 + $0x30] sm:$0xff]  ;;  %vm505_vm0 = vcmask 130048   ;;  %vm791_vm7 = vcmask 80896  }
  0x15   :  { %v1116_v1 = vld [vmem:[#allocation5 + $0x78] sm:$0xff]  ;;  %509 = vmatpush.bf16.msra.mxu0 %v1108_v0  ;;  %v1115_v4 = vld [vmem:[#allocation5 + $0x70] sm:$0xff]  ;;  %v1106_v8 = vld [vmem:[#allocation5 + $0x28] sm:$0xff]  ;;  %s1308_s2 = smov [#allocation10]   ;;  %s812_s13 = sshll.u32 %s1356_s4, 4  ;;  %s813_s13 = int_to_ptr.hbm [resolvable:$true] %s812_s13 }
  0x16   :  { %v1124_v2 = vld [vmem:[#allocation5 + $0xb8] sm:$0xff]  ;;  %522 = vmatpush.bf16.msra.mxu1 %v1116_v1  ;;  %v1123_v5 = vld [vmem:[#allocation5 + $0xb0] sm:$0xff]  ;;  %v1114_v9 = vld [vmem:[#allocation5 + $0x68] sm:$0xff]  ;;  %s810_s3 = sshll.u32 %s1308_s2, 4  ;;  %s811_s3 = int_to_ptr.vmem [resolvable:$true] %s810_s3 }
  0x17   :  { %535 = vmatpush.bf16.msra.mxu2 %v1124_v2  ;;  %v1132_v6 = vld [vmem:[#allocation5 + $0xf8] sm:$0xff]  ;;  %v1131_v7 = vld [vmem:[#allocation5 + $0xf0] sm:$0xff]  ;;  %v1122_v10 = vld [vmem:[#allocation5 + $0xa8] sm:$0xff] }
  0x18   :  { %548 = vmatpush.bf16.msra.mxu3 %v1132_v6  ;;  %v1130_v11 = vld [vmem:[#allocation5 + $0xe8] sm:$0xff]  ;;  %v1105_v12 = vld [vmem:[#allocation5 + $0x20] sm:$0xff]  ;;  %v1104_v16 = vld [vmem:[#allocation5 + $0x18] sm:$0xff] }
  0x19   :  { %510 = vmatpush.bf16.msra.mxu0 %v1107_v3  ;;  %v1113_v13 = vld [vmem:[#allocation5 + $0x60] sm:$0xff]  ;;  %v1112_v17 = vld [vmem:[#allocation5 + $0x58] sm:$0xff]  ;;  %v1103_v20 = vld [vmem:[#allocation5 + $0x10] sm:$0xff] }
  0x1a   :  { %523 = vmatpush.bf16.msra.mxu1 %v1115_v4  ;;  %v1121_v14 = vld [vmem:[#allocation5 + $0xa0] sm:$0xff]  ;;  %v1120_v18 = vld [vmem:[#allocation5 + $0x98] sm:$0xff]  ;;  %v1111_v21 = vld [vmem:[#allocation5 + $0x50] sm:$0xff] }
  0x1b   :  { %536 = vmatpush.bf16.msra.mxu2 %v1123_v5  ;;  %v1129_v15 = vld [vmem:[#allocation5 + $0xe0] sm:$0xff]  ;;  %v1128_v19 = vld [vmem:[#allocation5 + $0xd8] sm:$0xff]  ;;  %v1119_v22 = vld [vmem:[#allocation5 + $0x90] sm:$0xff] }
  0x1c   :  { %549 = vmatpush.bf16.msra.mxu3 %v1131_v7  ;;  %v1127_v23 = vld [vmem:[#allocation5 + $0xd0] sm:$0xff]  ;;  %v1102_v24 = vld [vmem:[#allocation5 + $0x8] sm:$0xff]  ;;  %v1101_v27 = vld [vmem:[#allocation5] sm:$0xff] }
  0x1d   :  { %511 = vmatpush.bf16.msra.mxu0 %v1106_v8  ;;  %v1110_v25 = vld [vmem:[#allocation5 + $0x48] sm:$0xff]  ;;  %v1109_v29 = vld [vmem:[#allocation5 + $0x40] sm:$0xff]  ;;  %v79_v31 = vld [vmem:[#allocation2 + $0x8] sm:$0xff] }
  0x1e   :  { %524 = vmatpush.bf16.msra.mxu1 %v1114_v9  ;;  %v1118_v26 = vld [vmem:[#allocation5 + $0x88] sm:$0xff]  ;;  %v1140_v32 = vld [vmem:[#allocation5 + $0x138] sm:$0xff]  ;;  %v1117_v34 = vld [vmem:[#allocation5 + $0x80] sm:$0xff]  ;;  %v86_v37 = vpack.c.bf16 %v79_v31, %v79_v31 }
  0x1f   :  { %537 = vmatpush.bf16.msra.mxu2 %v1122_v10  ;;  %v1126_v28 = vld [vmem:[#allocation5 + $0xc8] sm:$0xff]  ;;  %v1148_v33 = vld [vmem:[#allocation5 + $0x178] sm:$0xff]  ;;  %v1125_v38 = vld [vmem:[#allocation5 + $0xc0] sm:$0xff] }
  0x20   :  { %550 = vmatpush.bf16.msra.mxu3 %v1130_v11  ;;  %v78_v30 = vld [vmem:[#allocation2] sm:$0xff]  ;;  %v80_v35 = vld [vmem:[#allocation2 + $0x10] sm:$0xff]  ;;  %v81_v39 = vld [vmem:[#allocation2 + $0x18] sm:$0xff] }
  0x21   :  { %512 = vmatpush.bf16.msra.mxu0 %v1105_v12  ;;  %v85_v36 = vpack.c.bf16 %v78_v30, %v78_v30  ;;  %v1149_v40 = vld [vmem:[#allocation5 + $0x180] sm:$0xff]  ;;  %v1139_v41 = vld [vmem:[#allocation5 + $0x130] sm:$0xff]  ;;  %v87_v43 = vpack.c.bf16 %v80_v35, %v80_v35  ;;  %v88_v44 = vpack.c.bf16 %v81_v39, %v81_v39  ;;  %v1138_v45 = vld [vmem:[#allocation5 + $0x128] sm:$0xff] }
  0x22   :  { %525 = vmatpush.bf16.msra.mxu1 %v1113_v13  ;;  %v1147_v42 = vld [vmem:[#allocation5 + $0x170] sm:$0xff]  ;;  %v1146_v46 = vld [vmem:[#allocation5 + $0x168] sm:$0xff]  ;;  %v1137_v47 = vld [vmem:[#allocation5 + $0x120] sm:$0xff] }
  0x23   :  { %538 = vmatpush.bf16.msra.mxu2 %v1121_v14  ;;  %v1145_v48 = vld [vmem:[#allocation5 + $0x160] sm:$0xff]  ;;  %v1136_v49 = vld [vmem:[#allocation5 + $0x118] sm:$0xff]  ;;  %v1135_v52 = vld [vmem:[#allocation5 + $0x110] sm:$0xff] }
  0x24   :  { %551 = vmatpush.bf16.msra.mxu3 %v1129_v15  ;;  %v1144_v50 = vld [vmem:[#allocation5 + $0x158] sm:$0xff]  ;;  %v1143_v53 = vld [vmem:[#allocation5 + $0x150] sm:$0xff]  ;;  %v1134_v55 = vld [vmem:[#allocation5 + $0x108] sm:$0xff] }
  0x25   :  { %513 = vmatpush.bf16.msra.mxu0 %v1104_v16  ;;  %v84_v51 = vld [vmem:[#allocation2 + $0x30] sm:$0xff]  ;;  %v1142_v56 = vld [vmem:[#allocation5 + $0x148] sm:$0xff]  ;;  %v1133_v57 = vld [vmem:[#allocation5 + $0x100] sm:$0xff] }
  0x26   :  { %526 = vmatpush.bf16.msra.mxu1 %v1112_v17  ;;  %v91_v54 = vpack.c.bf16 %v84_v51, %v84_v51  ;;  %v1141_v58 = vld [vmem:[#allocation5 + $0x140] sm:$0xff]  ;;  %v82_v59 = vld [vmem:[#allocation2 + $0x20] sm:$0xff]  ;;  %v83_v60 = vld [vmem:[#allocation2 + $0x28] sm:$0xff] }
  0x27   :  { %539 = vmatpush.bf16.msra.mxu2 %v1120_v18  ;;  %v89_v61 = vpack.c.bf16 %v82_v59, %v82_v59  ;;  %v90_v62 = vpack.c.bf16 %v83_v60, %v83_v60  ;;  %v1051_v8 = vld [vmem:[#allocation7 + $0x70] sm:$0xf]  ;;  %v1100_v9 = vld [vmem:[#allocation7 + $0x74] sm:$0xf0]  ;;  %v1047_v12 = vld [vmem:[#allocation7 + $0x60] sm:$0xf] }
  0x28   :  { %552 = vmatpush.bf16.msra.mxu3 %v1128_v19  ;;  %v1052_v10 = vor.u32 %v1100_v9, %v1051_v8  ;;  %v1098_v13 = vld [vmem:[#allocation7 + $0x64] sm:$0xf0]  ;;  %v1043_v16 = vld [vmem:[#allocation7 + $0x50] sm:$0xf]  ;;  %v1096_v17 = vld [vmem:[#allocation7 + $0x54] sm:$0xf0] }
  0x29   :  { %514 = vmatpush.bf16.msra.mxu0 %v1103_v20  ;;  %v1048_v15 = vor.u32 %v1098_v13, %v1047_v12  ;;  %v1044_v18 = vor.u32 %v1096_v17, %v1043_v16  ;;  %v1039_v20 = vld [vmem:[#allocation7 + $0x40] sm:$0xf]  ;;  %v1090_v35 = vld [vmem:[#allocation7 + $0x24] sm:$0xf0]  ;;  %v1099_v13 = vld [vmem:[#allocation7 + $0x74] sm:$0xf] }
  0x2a   :  { %527 = vmatpush.bf16.msra.mxu1 %v1111_v21  ;;  %v1094_v21 = vld [vmem:[#allocation7 + $0x44] sm:$0xf0]  ;;  %v1160_v8 = vld [vmem:[#allocation8 + $0x1] ss:$0 sm:$0xff]  ;;  %v1097_v16 = vld [vmem:[#allocation7 + $0x64] sm:$0xf] }
  0x2b   :  { %540 = vmatpush.bf16.msra.mxu2 %v1119_v22  ;;  %v1086_v51 = vld [vmem:[#allocation7 + $0x4] sm:$0xf0]  ;;  %v1077_v17 = vld [vmem:[#allocation7 + $0x68] sm:$0xf0] }
  0x2c   :  { %553 = vmatpush.bf16.msra.mxu3 %v1127_v23 }
  0x2d   :  { %515 = vmatpush.bf16.msra.mxu0 %v1102_v24 }
  0x2e   :  { %528 = vmatpush.bf16.msra.mxu1 %v1110_v25  ;;  %v1040_v25 = vor.u32 %v1094_v21, %v1039_v20  ;;  %v1073_v20 = vld [vmem:[#allocation7 + $0x58] sm:$0xf0] }
  0x2f   :  { %541 = vmatpush.bf16.msra.mxu2 %v1118_v26 }
  0x30   :  { %554 = vmatpush.bf16.msra.mxu3 %v1126_v28  ;;  %v1092_v28 = vld [vmem:[#allocation7 + $0x34] sm:$0xf0] }
  0x31   :  { %516 = vmatpush.bf16.msra.mxu0 %v1101_v27  ;;  %v1035_v27 = vld [vmem:[#allocation7 + $0x30] sm:$0xf] }
  0x32   :  { %529 = vmatpush.bf16.msra.mxu1 %v1109_v29  ;;  %v1036_v31 = vor.u32 %v1092_v28, %v1035_v27  ;;  %v1091_v28 = vld [vmem:[#allocation7 + $0x34] sm:$0xf] }
  0x33   :  { %542 = vmatpush.bf16.msra.mxu2 %v1117_v34  ;;  %v1031_v34 = vld [vmem:[#allocation7 + $0x20] sm:$0xf] }
  0x34   :  { %517 = vmatmul.bf16.vlgmr.msra.gmra.mxu0 %v85_v36  ;;  %555 = vmatpush.bf16.msra.mxu3 %v1125_v38 }
  0x35   :  { %561 = vmatpush.bf16.msrb.mxu0 %v1140_v32  ;;  %530 = vmatmul.bf16.vlgmr.msra.gmra.mxu1 %v86_v37 }
  0x36   :  { %574 = vmatpush.bf16.msrb.mxu1 %v1148_v33  ;;  %543 = vmatmul.bf16.vlgmr.msra.gmra.mxu2 %v87_v43  ;;  %v1027_v43 = vld [vmem:[#allocation7 + $0x10] sm:$0xf] }
  0x37   :  { %594 = vmatpush.bf16.msrb.mxu2 %v1149_v40  ;;  %556 = vmatmul.bf16.vlgmr.msra.gmra.mxu3 %v88_v44  ;;  %v1032_v40 = vor.u32 %v1090_v35, %v1031_v34  ;;  %v1088_v44 = vld [vmem:[#allocation7 + $0x14] sm:$0xf0]  ;;  %v1089_v35 = vld [vmem:[#allocation7 + $0x24] sm:$0xf] }
  0x38   :  { %689 = vmatpush.bf16.msrb.mxu3 %v1052_v10 }
  0x39   :  { %562 = vmatpush.bf16.msrb.mxu0 %v1139_v41 }
  0x3a   :  { %575 = vmatpush.bf16.msrb.mxu1 %v1147_v42 }
  0x3c   :  { %690 = vmatpush.bf16.msrb.mxu3 %v1048_v15 }
  0x3d   :  { %563 = vmatpush.bf16.msrb.mxu0 %v1138_v45 }
  0x3e   :  { %576 = vmatpush.bf16.msrb.mxu1 %v1146_v46 }
  0x40   :  { %691 = vmatpush.bf16.msrb.mxu3 %v1044_v18  ;;  %v1080_v18 = vor.u32 %v1097_v16, %v1077_v17 }
  0x41   :  { %564 = vmatpush.bf16.msrb.mxu0 %v1137_v47  ;;  %v1028_v47 = vor.u32 %v1088_v44, %v1027_v43  ;;  %v1087_v43 = vld [vmem:[#allocation7 + $0x14] sm:$0xf]  ;;  %v1057_v44 = vld [vmem:[#allocation7 + $0x18] sm:$0xf0] }
  0x42   :  { %577 = vmatpush.bf16.msrb.mxu1 %v1145_v48 }
  0x44   :  { %692 = vmatpush.bf16.msrb.mxu3 %v1040_v25 }
  0x45   :  { %565 = vmatpush.bf16.msrb.mxu0 %v1136_v49 }
  0x46   :  { %578 = vmatpush.bf16.msrb.mxu1 %v1144_v50  ;;  %1020 = vmatmul.msk.bf16.vlgmr.msrb.gmra.mxu2 %vm505_vm0, %v91_v54  ;;  %v1023_v50 = vld [vmem:[#allocation7] sm:$0xf] }
  0x47   :  { %v1024_v54 = vor.u32 %v1086_v51, %v1023_v50 }
  0x48   :  { %693 = vmatpush.bf16.msrb.mxu3 %v1036_v31 }
  0x49   :  { %566 = vmatpush.bf16.msrb.mxu0 %v1135_v52 }
  0x4a   :  { %579 = vmatpush.bf16.msrb.mxu1 %v1143_v53 }
  0x4c   :  { %694 = vmatpush.bf16.msrb.mxu3 %v1032_v40 }
  0x4d   :  { %567 = vmatpush.bf16.msrb.mxu0 %v1134_v55 }
  0x4e   :  { %580 = vmatpush.bf16.msrb.mxu1 %v1142_v56 }
  0x50   :  { %695 = vmatpush.bf16.msrb.mxu3 %v1028_v47  ;;  %v1060_v47 = vor.u32 %v1087_v43, %v1057_v44 }
  0x51   :  { %568 = vmatpush.bf16.msrb.mxu0 %v1133_v57 }
  0x52   :  { %581 = vmatpush.bf16.msrb.mxu1 %v1141_v58 }
  0x54   :  { %569 = vmatmul.bf16.vlgmr.msrb.gmra.mxu0 %v89_v61  ;;  %696 = vmatpush.bf16.msrb.mxu3 %v1024_v54 }
  0x55   :  { %582 = vmatmul.bf16.vlgmr.msrb.gmra.mxu1 %v90_v62 }
  0xb1   :  { %v518_v63 = vpop.f32.mrf.mxu0 }
  0xb2   :  { %v531_v0 = vpop.f32.mrf.mxu1 }
  0xb3   :  { %v532_v7 = vadd.f32 %v531_v0, %v518_v63 }
  0xb9   :  { %v520_v1 = vpop.f32.mrf.mxu0  ;;  %v544_v3 = vpop.f32.mrf.mxu2 }
  0xba   :  { %v533_v2 = vpop.f32.mrf.mxu1  ;;  %v557_v4 = vpop.f32.mrf.mxu3  ;;  %v545_v11 = vadd.f32 %v544_v3, %v532_v7 }
  0xbc   :  { %v558_v19 = vadd.f32 %v557_v4, %v545_v11 }
  0xc1   :  { %v546_v5 = vpop.f32.mrf.mxu2 }
  0xc2   :  { %v559_v6 = vpop.f32.mrf.mxu3  ;;  %v1159_v5 = vld [vmem:[#allocation8] ss:$0 sm:$0xff] }
  0xc9   :  { %v596_v14 = vpop.f32.mrf.mxu2 }
  0xd1   :  { %v570_v22 = vpop.f32.mrf.mxu0  ;;  %v598_v29 = vpop.f32.mrf.mxu2 }
  0xd2   :  { %v583_v23 = vpop.f32.mrf.mxu1  ;;  %v571_v24 = vadd.f32 %v570_v22, %v558_v19  ;;  %v1095_v19 = vld [vmem:[#allocation7 + $0x54] sm:$0xf]  ;;  %v1093_v22 = vld [vmem:[#allocation7 + $0x44] sm:$0xf]  ;;  %v1065_v29 = vld [vmem:[#allocation7 + $0x38] sm:$0xf0] }
  0xd3   :  { %v1076_v21 = vor.u32 %v1095_v19, %v1073_v20 }
  0xd4   :  { %v584_v26 = vadd.f32 %v583_v23, %v571_v24  ;;  %v1069_v23 = vld [vmem:[#allocation7 + $0x48] sm:$0xf0] }
  0xd5   :  { %v1072_v24 = vor.u32 %v1093_v22, %v1069_v23 }
  0xd6   :  { %v597_v30 = vadd.f32 %v596_v14, %v584_v26  ;;  %v1081_v14 = vld [vmem:[#allocation7 + $0x78] sm:$0xf0] }
  0xd7   :  { %v1084_v15 = vor.u32 %v1099_v13, %v1081_v14 }
  0xd8   :  { %v600_v32 = vrot.slane %v597_v30, 4  ;;  %v606_v33 = vmul.f32 %v597_v30, %v597_v30 }
  0xd9   :  { %v572_v36 = vpop.f32.mrf.mxu0  ;;  %778 = vmatpush.bf16.msra.mxu2 %v1084_v15 }
  0xda   :  { %v585_v37 = vpop.f32.mrf.mxu1  ;;  %v601_v38 = vadd.f32 %v600_v32, %v597_v30  ;;  %v607_v39 = vrot.slane %v606_v33, 4  ;;  %v1061_v36 = vld [vmem:[#allocation7 + $0x28] sm:$0xf0] }
  0xdb   :  { %v1064_v37 = vor.u32 %v1089_v35, %v1061_v36 }
  0xdc   :  { %v602_v41 = vrot.slane %v601_v38, 2  ;;  %v608_v42 = vadd.f32 %v607_v39, %v606_v33 }
  0xdd   :  { %779 = vmatpush.bf16.msra.mxu2 %v1080_v18 }
  0xde   :  { %v603_v45 = vadd.f32 %v602_v41, %v601_v38  ;;  %v609_v46 = vrot.slane %v608_v42, 2 }
  0xe0   :  { %v604_v48 = vrot.slane %v603_v45, 1  ;;  %v610_v49 = vadd.f32 %v609_v46, %v608_v42 }
  0xe1   :  { %780 = vmatpush.bf16.msra.mxu2 %v1076_v21 }
  0xe2   :  { %v605_v52 = vadd.f32 %v604_v48, %v603_v45  ;;  %v611_v53 = vrot.slane %v610_v49, 1  ;;  %v1085_v48 = vld [vmem:[#allocation7 + $0x4] sm:$0xf] }
  0xe4   :  { %v612_v55 = vadd.f32 %v611_v53, %v610_v49  ;;  %v613_v56 = vmul.f32 0.125, %v605_v52  ;;  %v1053_v49 = vld [vmem:[#allocation7 + $0x8] sm:$0xf0] }
  0xe5   :  { %781 = vmatpush.bf16.msra.mxu2 %v1072_v24  ;;  %v1056_v52 = vor.u32 %v1085_v48, %v1053_v49 }
  0xe6   :  { %v614_v57 = vmul.f32 0.125, %v612_v55  ;;  %v615_v58 = vmul.f32 %v613_v56, %v613_v56  ;;  %v618_v4 = vsub.f32 %v597_v30, %v613_v56  ;;  %v1068_v30 = vor.u32 %v1091_v28, %v1065_v29 }
  0xe8   :  { %v616_v59 = vsub.f32 %v614_v57, %v615_v58 }
  0xe9   :  { %782 = vmatpush.bf16.msra.mxu2 %v1068_v30 }
  0xea   :  { %v617_v60 = vmax.f32 %v616_v59, 0.0 }
  0xec   :  { %v619_v61 = vadd.f32 1e-05, %v617_v60 }
  0xed   :  { %783 = vmatpush.bf16.msra.mxu2 %v1064_v37 }
  0xee   :  { %1164 = vrsqrt.f32 %v619_v61  ;;  %vm626_vm2 = vweird.f32 %v619_v61 }
  0xf1   :  { %784 = vmatpush.bf16.msra.mxu2 %v1060_v47 }
  0xf4   :  { %v1165_v62 = vpop.eup %1164 }
  0xf5   :  { %v621_v63 = vmul.f32 %v1165_v62, %v619_v61  ;;  %vm627_vm1 = vweird.f32 %v1165_v62  ;;  %785 = vmatpush.bf16.msra.mxu2 %v1056_v52 }
  0xf6   :  { %vm628_vm3 = vmor %vm626_vm2, %vm627_vm1 }
  0xf7   :  { %v622_v0 = vmul.f32 %v1165_v62, %v621_v63 }
  0xf9   :  { %v623_v1 = vmul.f32 0.5, %v622_v0 }
  0xfb   :  { %v624_v2 = vsub.f32 1.5, %v623_v1  ;;  %v1161_v1 = vld [vmem:[#allocation8 + $0x2] ss:$0 sm:$0xff] }
  0xfd   :  { %v625_v3 = vmul.f32 %v1165_v62, %v624_v2 }
  0xff   :  { %v629_v6 = vsel %vm628_vm3, %v1165_v62, %v625_v3 }
 0x100   :  { %v630_v7 = vmul.f32 %v629_v6, %v618_v4  ;;  %v1162_v4 = vld [vmem:[#allocation8 + $0x3] ss:$0 sm:$0xff] }
 0x102   :  { %v634_v9 = vmul.f32 %v1159_v5, %v630_v7 }
 0x104   :  { %v638_v10 = vadd.f32 %v1160_v8, %v634_v9  ;;  %v1163_v9 = vld [vmem:[#allocation8 + $0x4] ss:$0 sm:$0xff] }
 0x106   :  { %v639_v11 = vmax.f32 %v638_v10, 0.0 }
 0x108   :  { %v640_v12 = vpack.c.bf16 %v639_v11, %v639_v11 }
 0x10a   :  { %697 = vmatmul.bf16.vlgmr.msrb.gmra.mxu3 %v640_v12 }
 0x18d   :  { %v698_v25 = vpop.f32.mrf.mxu3 }
 0x18e   :  { %v702_v26 = vrot.slane %v698_v25, 4  ;;  %v708_v27 = vmul.f32 %v698_v25, %v698_v25 }
 0x190   :  { %v703_v31 = vadd.f32 %v702_v26, %v698_v25  ;;  %v709_v32 = vrot.slane %v708_v27, 4 }
 0x192   :  { %v704_v33 = vrot.slane %v703_v31, 2  ;;  %v710_v34 = vadd.f32 %v709_v32, %v708_v27 }
 0x194   :  { %v705_v38 = vadd.f32 %v704_v33, %v703_v31  ;;  %v711_v39 = vrot.slane %v710_v34, 2 }
 0x195   :  { %v700_v40 = vpop.f32.mrf.mxu3 }
 0x196   :  { %v706_v41 = vrot.slane %v705_v38, 1  ;;  %v712_v42 = vadd.f32 %v711_v39, %v710_v34 }
 0x198   :  { %v707_v45 = vadd.f32 %v706_v41, %v705_v38  ;;  %v713_v46 = vrot.slane %v712_v42, 1 }
 0x19a   :  { %v714_v50 = vadd.f32 %v713_v46, %v712_v42  ;;  %v715_v51 = vmul.f32 0.125, %v707_v45 }
 0x19c   :  { %v716_v53 = vmul.f32 0.125, %v714_v50  ;;  %v717_v54 = vmul.f32 %v715_v51, %v715_v51  ;;  %v720_v0 = vsub.f32 %v698_v25, %v715_v51 }
 0x19e   :  { %v718_v55 = vsub.f32 %v716_v53, %v717_v54 }
 0x1a0   :  { %v719_v56 = vmax.f32 %v718_v55, 0.0 }
 0x1a2   :  { %v721_v57 = vadd.f32 1e-05, %v719_v56 }
 0x1a4   :  { %1166 = vrsqrt.f32 %v721_v57  ;;  %vm728_vm5 = vweird.f32 %v721_v57 }
 0x1aa   :  { %v1167_v58 = vpop.eup %1166 }
 0x1ab   :  { %v723_v59 = vmul.f32 %v1167_v58, %v721_v57  ;;  %vm729_vm4 = vweird.f32 %v1167_v58 }
 0x1ac   :  { %vm730_vm6 = vmor %vm728_vm5, %vm729_vm4 }
 0x1ad   :  { %v724_v60 = vmul.f32 %v1167_v58, %v723_v59 }
 0x1af   :  { %v725_v61 = vmul.f32 0.5, %v724_v60 }
 0x1b1   :  { %v726_v62 = vsub.f32 1.5, %v725_v61 }
 0x1b3   :  { %v727_v63 = vmul.f32 %v1167_v58, %v726_v62 }
 0x1b5   :  { %v731_v2 = vsel %vm730_vm6, %v1167_v58, %v727_v63 }
 0x1b6   :  { %v732_v3 = vmul.f32 %v731_v2, %v720_v0 }
 0x1b8   :  { %v736_v5 = vmul.f32 %v1161_v1, %v732_v3 }
 0x1ba   :  { %v740_v6 = vadd.f32 %v1162_v4, %v736_v5 }
 0x1bc   :  { %v741_v7 = vmax.f32 %v740_v6, 0.0 }
 0x1be   :  { %v742_v8 = vpack.c.bf16 %v741_v7, %v741_v7 }
 0x1c0   :  { %786 = vmatmul.bf16.vlgmr.msra.gmra.mxu2 %v742_v8 }
 0x243   :  { %v787_v10 = vpop.f32.mrf.mxu2 }
 0x244   :  { %v788_v11 = vadd.f32 %v1163_v9, %v787_v10 }
 0x246   :  { %v792_v12 = vsel %vm791_vm7, %v788_v11, -inf }
 0x247   :  { %793 = vmax.xlane.f32.xlu0 %v792_v12 }
 0x24b   :  { %v789_v13 = vpop.f32.mrf.mxu2 }
 0x2ba   :  { %v794_v14 = vpop.xlane.xlu0 %793 }
 0x2bb   :  { %v795_v15 = vsub.f32 %v788_v11, %v794_v14 }
 0x2bd   :  { %v796_v16 = vmul.f32 1.442695, %v795_v15 }
 0x2bf   :  { %1168 = vpow2.f32 %v796_v16 }
 0x2c5   :  { %v1169_v17 = vpop.eup %1168 }
 0x2c6   :  { %v798_v18 = vsel %vm791_vm7, %v1169_v17, 0.0 }
 0x2c7   :  { %799 = vadd.xlane.f32.xlu0 %v798_v18 }
 0x33a   :  { %v800_v19 = vpop.xlane.xlu0 %799 }
 0x33b   :  { %1170 = vlog2.f32 %v800_v19 }
 0x341   :  { %v1171_v20 = vpop.eup %1170 }
 0x342   :  { %v802_v21 = vmul.f32 0.6931472, %v1171_v20 }
 0x344   :  { %v803_v22 = vsub.f32 %v795_v15, %v802_v21 }
 0x346   :  { %804 = vst.msk [vmem:[#allocation10] sm:$0xff] %vm791_vm7, %v803_v22 }
 0x347   :  { %815 = dma.vmem_to_hbm [thread:$0]  %s811_s3, 128, %s813_s13, [#allocation4]  }
 0x348   :  { %1298 = dma.done.wait [#allocation4], 128  }
 0x349   :  { %1299 = vsyncadd [#allocation4], 4294967168 }
 0x34a   :  { %820 = vsyncpa [#allocation3], 1 }
 0x34b   :  { %821 = vsyncpa [#allocation6], 1 }
 0x34c   :  { %822 = vsyncpa [#allocation9], 1 }
 0x34d   :  { %823 = vsyncpa [#allocation4], 1 }

</bundles_post_ra>
